<compile_context>
chip_gen: v5e
topology: v5e:2x2
jax: 0.10.0
libtpu: 0.0.40
codegen_flags: <defaults>
</compile_context>

<pallas_src>
import functools

import numpy as np
import jax
import jax.numpy as jnp
from jax import lax
from jax.experimental import pallas as pl
from jax.experimental.pallas import tpu as pltpu

POOL_SIZES = (1, 2, 3, 4)
P_TOTAL = sum(p * p for p in POOL_SIZES)   # 30
P_PAD = 32                                 # pooled axis padded to sublane-friendly 32
BN_EPS = 1e-5


# ----------------------------------------------------------------------------
# Constant linear operators (host-side numpy, cached per spatial size).
# ----------------------------------------------------------------------------
def _adaptive_pool_matrix(in_size, out_size):
    """Row-stochastic (out_size, in_size) matrix == 1-D AdaptiveAvgPool."""
    m = np.zeros((out_size, in_size), np.float32)
    for i in range(out_size):
        s = (i * in_size) // out_size
        e = -((-(i + 1) * in_size) // out_size)  # ceil((i+1)*in/out)
        m[i, s:e] = 1.0 / float(e - s)
    return m


def _bilinear_up_matrix(out_size, in_size):
    """(out_size, in_size) matrix for 1-D bilinear upsample, align_corners=True."""
    m = np.zeros((out_size, in_size), np.float32)
    if in_size == 1:
        m[:, 0] = 1.0
        return m
    scale = (in_size - 1) / (out_size - 1)
    for o in range(out_size):
        src = o * scale
        i0 = min(int(np.floor(src)), in_size - 1)
        i1 = min(i0 + 1, in_size - 1)
        frac = src - i0
        m[o, i0] += 1.0 - frac
        m[o, i1] += frac
    return m


@functools.lru_cache(maxsize=None)
def _pooling_operators(H, W):
    """A (P_TOTAL, HW) pool operator, Ut (P_TOTAL, HW) transposed upsample
    operator (both lane-dense), and per-branch column offsets."""
    a_blocks, ut_blocks, offsets = [], [], [0]
    for p in POOL_SIZES:
        ah = _adaptive_pool_matrix(H, p)                     # (p, H)
        aw = _adaptive_pool_matrix(W, p)                     # (p, W)
        a2 = np.einsum("ih,jw->ijhw", ah, aw).reshape(p * p, H * W)
        uh = _bilinear_up_matrix(H, p)                       # (H, p)
        uw = _bilinear_up_matrix(W, p)                       # (W, p)
        u2 = np.einsum("hi,wj->hwij", uh, uw).reshape(H * W, p * p)
        a_blocks.append(a2)
        ut_blocks.append(u2.T)                               # (p*p, HW)
        offsets.append(offsets[-1] + p * p)
    return (np.concatenate(a_blocks, axis=0),
            np.concatenate(ut_blocks, axis=0),
            tuple(offsets))


@functools.lru_cache(maxsize=None)
def _branch_mask(offsets, inter):
    """Block-diagonal 0/1 mask (4*inter, P_PAD) selecting each branch's own block."""
    n_br = inter * len(POOL_SIZES)
    mask = np.zeros((n_br, P_PAD), np.float32)
    for m in range(len(POOL_SIZES)):
        mask[m * inter:(m + 1) * inter, offsets[m]:offsets[m + 1]] = 1.0
    return mask


# ----------------------------------------------------------------------------
# Parameters (deterministic synthetic init, eval-mode BN folded into the 1x1
# convs), stored channel-major: conv weights as (out_ch, in_ch).
# ----------------------------------------------------------------------------
def init_params(key, in_channels, out_channels):
    inter = in_channels // 4
    keys = jax.random.split(key, 20)
    ki = iter(range(len(keys)))

    def fold(w_oc_ic, bias, gamma, beta, mean, var):
        s = gamma / jnp.sqrt(var + BN_EPS)
        return (w_oc_ic * s[:, None]).astype(jnp.float32), \
               ((bias - mean) * s + beta).astype(jnp.float32)

    w_rows, b_rows = [], []
    for _ in POOL_SIZES:
        w = jax.random.normal(keys[next(ki)], (inter, in_channels), jnp.float32) * 0.1
        b = jax.random.normal(keys[next(ki)], (inter,), jnp.float32) * 0.05
        gamma = 1.0 + 0.1 * jax.random.normal(keys[next(ki)], (inter,), jnp.float32)
        beta = 0.05 * jax.random.normal(keys[next(ki)], (inter,), jnp.float32)
        wf, bf = fold(w, b, gamma, beta, jnp.zeros((inter,)), jnp.ones((inter,)))
        w_rows.append(wf)
        b_rows.append(bf)
    w_pool = jnp.concatenate(w_rows, axis=0)                  # (4*inter, C)
    b_pool = jnp.concatenate(b_rows, axis=0)                  # (4*inter,)

    cat_c = 2 * in_channels
    w = jax.random.normal(keys[next(ki)], (out_channels, cat_c), jnp.float32) * 0.1
    b = jax.random.normal(keys[next(ki)], (out_channels,), jnp.float32) * 0.05
    gamma = 1.0 + 0.1 * jax.random.normal(keys[next(ki)], (out_channels,), jnp.float32)
    beta = 0.05 * jax.random.normal(keys[next(ki)], (out_channels,), jnp.float32)
    w_out, b_out = fold(w, b, gamma, beta,
                        jnp.zeros((out_channels,)), jnp.ones((out_channels,)))

    return dict(
        w_pool=w_pool,                         # (4*inter, C)
        b_pool=b_pool,                         # (4*inter,)
        w_direct=w_out[:, :in_channels],       # (out_ch, C)
        w_branch=w_out[:, in_channels:],       # (out_ch, 4*inter)
        b_out=b_out.reshape(out_channels, 1),  # (out_ch, 1)
    )


# ----------------------------------------------------------------------------
# Phase (a): HW-tiled reduction -> per-batch branch result y_br (out_ch, P_PAD).
# All f32 (accuracy; negligible FLOPs vs phase (b)).
# ----------------------------------------------------------------------------
def _ppm_pool_kernel(x_ref, a_ref, wpool_ref, bpool_ref, mask_ref, wbr_ref,
                     ybr_ref, acc_ref):
    t = pl.program_id(1)

    @pl.when(t == 0)
    def _():
        acc_ref[...] = jnp.zeros_like(acc_ref)

    # Partial adaptive average pools: (C, T) x (P_PAD, T) contracted on lanes.
    acc_ref[...] += lax.dot_general(
        x_ref[...], a_ref[...],
        dimension_numbers=(((1,), (1,)), ((), ())),
        preferred_element_type=jnp.float32)                    # (C, P_PAD)

    @pl.when(t == pl.num_programs(1) - 1)
    def _():
        z = jnp.dot(wpool_ref[...], acc_ref[...],
                    preferred_element_type=jnp.float32)        # (4*inter, P_PAD)
        z = jnp.maximum((z + bpool_ref[...]) * mask_ref[...], 0.0)
        ybr_ref[...] = jnp.dot(wbr_ref[...], z,
                               preferred_element_type=jnp.float32)  # (out_ch, P_PAD)


# ----------------------------------------------------------------------------
# Phase (b): HW-tiled fused output conv + upsample.
#   out_tile = relu( [y_br | W_dir] @ [U^T_tile ; x_tile] + b_out )
# ----------------------------------------------------------------------------
def _ppm_out_kernel(lhs_ref, x_ref, ut_ref, bout_ref, o_ref, rhs_ref):
    pp = ut_ref.shape[0]          # P_PAD (32, sublane-aligned for bf16)
    c = x_ref.shape[0]            # C

    # Assemble fused RHS [U^T_tile ; x_tile] in a bf16 VMEM scratch.
    rhs_ref[pl.ds(0, pp), :] = ut_ref[...]
    rhs_ref[pl.ds(pp, c), :] = x_ref[...].astype(jnp.bfloat16)   # in-kernel f32->bf16

    acc = jnp.dot(lhs_ref[...], rhs_ref[...],
                  preferred_element_type=jnp.float32)            # (out_ch, T)
    o_ref[...] = jnp.maximum(acc + bout_ref[...], 0.0).astype(o_ref.dtype)


def _pick_tile(hw_pad):
    for t in (2048, 1024, 512, 256, 128):
        if hw_pad % t == 0:
            return t
    return hw_pad


@jax.jit
def _ppm_pallas(x_flat, a_op, ut_op, w_pool, b_pool, mask, w_dir, w_br, b_out):
    N, C, HW_pad = x_flat.shape
    n_br = w_pool.shape[0]
    out_ch = w_dir.shape[0]
    p_pad = a_op.shape[0]
    T = _pick_tile(HW_pad)
    n_t = HW_pad // T

    # ---- phase (a): tiny per-batch branch result, f32 ----
    y_br = pl.pallas_call(
        _ppm_pool_kernel,
        out_shape=jax.ShapeDtypeStruct((N, out_ch, p_pad), jnp.float32),
        grid=(N, n_t),
        in_specs=[
            pl.BlockSpec((pl.Squeezed(), C, T), lambda n, t: (n, 0, t)),   # x (f32)
            pl.BlockSpec((p_pad, T), lambda n, t: (0, t)),                 # A (lane-dense)
            pl.BlockSpec((n_br, C), lambda n, t: (0, 0)),                  # w_pool
            pl.BlockSpec((n_br, 1), lambda n, t: (0, 0)),                  # b_pool
            pl.BlockSpec((n_br, p_pad), lambda n, t: (0, 0)),              # mask
            pl.BlockSpec((out_ch, n_br), lambda n, t: (0, 0)),             # w_branch
        ],
        out_specs=pl.BlockSpec((pl.Squeezed(), out_ch, p_pad),
                               lambda n, t: (n, 0, 0)),
        scratch_shapes=[pltpu.VMEM((C, p_pad), jnp.float32)],
        compiler_params=pltpu.CompilerParams(
            dimension_semantics=("parallel", "arbitrary")),
    )(x_flat, a_op, w_pool, b_pool, mask, w_br)

    # Fused LHS for the output conv: columns [0:P_PAD] hit U^T, [P_PAD:] hit x.
    lhs = jnp.concatenate(
        [y_br.astype(jnp.bfloat16),
         jnp.broadcast_to(w_dir.astype(jnp.bfloat16)[None], (N, out_ch, C))],
        axis=2)                                                  # (N, out_ch, P_PAD + C)
    kp = p_pad + C

    # ---- phase (b): HW-tiled fused matmul, bf16 in / f32 acc / bf16 out ----
    out_flat = pl.pallas_call(
        _ppm_out_kernel,
        out_shape=jax.ShapeDtypeStruct((N, out_ch, HW_pad), jnp.bfloat16),
        grid=(N, n_t),
        in_specs=[
            pl.BlockSpec((pl.Squeezed(), out_ch, kp), lambda n, t: (n, 0, 0)),  # lhs
            pl.BlockSpec((pl.Squeezed(), C, T), lambda n, t: (n, 0, t)),        # x (f32)
            pl.BlockSpec((p_pad, T), lambda n, t: (0, t)),                      # U^T (bf16)
            pl.BlockSpec((out_ch, 1), lambda n, t: (0, 0)),                     # b_out
        ],
        out_specs=pl.BlockSpec((pl.Squeezed(), out_ch, T), lambda n, t: (n, 0, t)),
        scratch_shapes=[pltpu.VMEM((kp, T), jnp.bfloat16)],
        compiler_params=pltpu.CompilerParams(
            dimension_semantics=("parallel", "parallel")),
    )(lhs, x_flat, ut_op, b_out)

    return out_flat


def ppm_forward(x_nchw, params):
    N, C, H, W = x_nchw.shape
    inter = C // 4
    HW = H * W
    HW_pad = ((HW + 127) // 128) * 128   # lane-dense output blocks

    A, Ut, offsets = _pooling_operators(H, W)        # (P_TOTAL, HW) each
    a_op = np.zeros((P_PAD, HW_pad), np.float32)
    a_op[:P_TOTAL, :HW] = A
    ut_op = np.zeros((P_PAD, HW_pad), np.float32)
    ut_op[:P_TOTAL, :HW] = Ut
    mask = _branch_mask(offsets, inter)              # (4*inter, P_PAD)

    # NCHW -> (N, C, HW): pure reshape; keep f32, cast to bf16 inside the kernel.
    x_flat = x_nchw.reshape(N, C, HW).astype(jnp.float32)
    if HW_pad != HW:
        x_flat = jnp.pad(x_flat, ((0, 0), (0, 0), (0, HW_pad - HW)))

    out_flat = _ppm_pallas(
        x_flat,
        jnp.asarray(a_op),                           # f32 (pooling kept exact-ish)
        jnp.asarray(ut_op, jnp.bfloat16),            # bf16 (feeds the fused matmul)
        params["w_pool"],                            # f32
        params["b_pool"].reshape(-1, 1),             # f32
        jnp.asarray(mask),                           # f32
        params["w_direct"],                          # f32 (cast to bf16 in jit)
        params["w_branch"],                          # f32
        params["b_out"],                             # f32
    )
    out_ch = params["w_direct"].shape[0]
    return out_flat[:, :, :HW].reshape(N, out_ch, H, W)   # bf16 output


# ----------------------------------------------------------------------------
# Plain-JAX f32 reference (explicit pool / conv / relu / upsample / concat / conv).
# ----------------------------------------------------------------------------
def ppm_reference(x_nchw, params):
    N, C, H, W = x_nchw.shape
    inter = C // 4
    HW = H * W
    A, Ut, offsets = _pooling_operators(H, W)
    A = jnp.asarray(A)
    Ut = jnp.asarray(Ut)
    xf = x_nchw.reshape(N, C, HW).astype(jnp.float32)

    feats = [xf]
    for m in range(len(POOL_SIZES)):
        s, e = offsets[m], offsets[m + 1]
        pooled = jnp.einsum("nch,ph->ncp", xf, A[s:e])                    # (N, C, p*p)
        w_m = params["w_pool"][m * inter:(m + 1) * inter]
        b_m = params["b_pool"][m * inter:(m + 1) * inter]
        z = jnp.maximum(jnp.einsum("ic,ncp->nip", w_m, pooled)
                        + b_m[None, :, None], 0.0)
        feats.append(jnp.einsum("ph,nip->nih", Ut[s:e], z))               # (N, inter, HW)
    cat = jnp.concatenate(feats, axis=1)                                  # (N, 2C, HW)
    w_full = jnp.concatenate([params["w_direct"], params["w_branch"]], axis=1)
    out = jnp.einsum("oc,nch->noh", w_full, cat) + params["b_out"][None]
    out = jnp.maximum(out, 0.0)
    return out.reshape(N, -1, H, W)


if __name__ == "__main__":
    key = jax.random.PRNGKey(0)
    k_x, k_p = jax.random.split(key)

    N, C, H, W = 2, 8, 16, 16          # in_channels=8 -> inter=2, concat=16
    out_channels = 16

    x = jax.random.normal(k_x, (N, C, H, W), jnp.float32)
    params = init_params(k_p, C, out_channels)

    y = jax.block_until_ready(ppm_forward(x, params))
    assert y.shape == (N, out_channels, H, W)
    assert y.dtype == jnp.bfloat16
    y_f32 = y.astype(jnp.float32)
    assert bool(jnp.all(jnp.isfinite(y_f32)))

    # bf16 matmul inputs / bf16 output vs f32 reference -> loose tolerance.
    y_ref = jax.block_until_ready(ppm_reference(x, params))
    max_err = float(jnp.max(jnp.abs(y_f32 - y_ref)))
    assert max_err < 5e-2, f"max abs error {max_err}"

    print("KERNEL_OK")
</pallas_src>

<mosaic_0001>
module attributes {stable_mosaic.version = 11 : i64} {
  func.func @_ppm_pool_kernel(%arg0: i32, %arg1: i32, %arg2: memref<1x8x256xf32, #tpu.memory_space<vmem>>, %arg3: memref<32x256xf32, #tpu.memory_space<vmem>>, %arg4: memref<8x8xf32, #tpu.memory_space<vmem>>, %arg5: memref<8x1xf32, #tpu.memory_space<vmem>>, %arg6: memref<8x32xf32, #tpu.memory_space<vmem>>, %arg7: memref<16x8xf32, #tpu.memory_space<vmem>>, %arg8: memref<1x16x32xf32, #tpu.memory_space<vmem>>, %arg9: memref<8x32xf32, #tpu.memory_space<vmem>>) attributes {dimension_semantics = [#tpu.dimension_semantics<parallel>, #tpu.dimension_semantics<arbitrary>], iteration_bounds = array<i64: 2, 1>, scalar_prefetch = 0 : i64, scratch_operands = 1 : i64, tpu.core_type = #tpu.core_type<tc>, window_params = [{transform_indices = @transform_0, window_bounds = array<i64: 1, 8, 256>}, {transform_indices = @transform_1, window_bounds = array<i64: 32, 256>}, {pipeline_mode = #tpu.pipeline_mode<synchronous>, transform_indices = @transform_2, window_bounds = array<i64: 8, 8>}, {pipeline_mode = #tpu.pipeline_mode<synchronous>, transform_indices = @transform_3, window_bounds = array<i64: 8, 1>}, {pipeline_mode = #tpu.pipeline_mode<synchronous>, transform_indices = @transform_4, window_bounds = array<i64: 8, 32>}, {pipeline_mode = #tpu.pipeline_mode<synchronous>, transform_indices = @transform_5, window_bounds = array<i64: 16, 8>}, {transform_indices = @transform_6, window_bounds = array<i64: 1, 16, 32>}]} {
    %c0_i32 = arith.constant 0 : i32
    %0 = arith.cmpi eq, %arg1, %c0_i32 : i32
    %1 = arith.extui %0 : i1 to i32
    %c0_i32_0 = arith.constant 0 : i32
    %2 = arith.cmpi ne, %1, %c0_i32_0 : i32
    scf.if %2 {
      %cst_11 = arith.constant 0.000000e+00 : f32
      %13 = vector.broadcast %cst_11 : f32 to vector<8x32xf32>
      %c0_12 = arith.constant 0 : index
      %c0_13 = arith.constant 0 : index
      %14 = vector.load %arg9[%c0_12, %c0_13] : memref<8x32xf32, #tpu.memory_space<vmem>>, vector<8x32xf32>
      tpu.vector_store %arg9[%c0_12, %c0_13], %13 {strides = array<i32>} : memref<8x32xf32, #tpu.memory_space<vmem>>, vector<8x32xf32>,
    } else {
    }
    %c0 = arith.constant 0 : index
    %c0_1 = arith.constant 0 : index
    %3 = vector.load %arg9[%c0, %c0_1] : memref<8x32xf32, #tpu.memory_space<vmem>>, vector<8x32xf32>
    %c0_2 = arith.constant 0 : index
    %c0_3 = arith.constant 0 : index
    %c0_4 = arith.constant 0 : index
    %4 = vector.load %arg2[%c0_2, %c0_3, %c0_4] : memref<1x8x256xf32, #tpu.memory_space<vmem>>, vector<1x8x256xf32>
    %5 = vector.shape_cast %4 : vector<1x8x256xf32> to vector<8x256xf32>
    %c0_5 = arith.constant 0 : index
    %c0_6 = arith.constant 0 : index
    %6 = vector.load %arg3[%c0_5, %c0_6] : memref<32x256xf32, #tpu.memory_space<vmem>>, vector<32x256xf32>
    %cst = arith.constant dense<0.000000e+00> : vector<8x32xf32>
    %7 = tpu.matmul %5, %6, %cst {dimension_numbers = #tpu.dot_dimension_numbers<[1], [1], [0], [0], [0, 0, 1, 0], [], []>} : vector<8x256xf32>, vector<32x256xf32>, vector<8x32xf32> -> vector<8x32xf32>
    %8 = arith.addf %3, %7 : vector<8x32xf32>
    %c0_7 = arith.constant 0 : index
    %c0_8 = arith.constant 0 : index
    %9 = vector.load %arg9[%c0_7, %c0_8] : memref<8x32xf32, #tpu.memory_space<vmem>>, vector<8x32xf32>
    tpu.vector_store %arg9[%c0_7, %c0_8], %8 {strides = array<i32>} : memref<8x32xf32, #tpu.memory_space<vmem>>, vector<8x32xf32>,
    %c0_i32_9 = arith.constant 0 : i32
    %10 = arith.cmpi eq, %arg1, %c0_i32_9 : i32
    %11 = arith.extui %10 : i1 to i32
    %c0_i32_10 = arith.constant 0 : i32
    %12 = arith.cmpi ne, %11, %c0_i32_10 : i32
    scf.if %12 {
      %c0_11 = arith.constant 0 : index
      %c0_12 = arith.constant 0 : index
      %13 = vector.load %arg4[%c0_11, %c0_12] : memref<8x8xf32, #tpu.memory_space<vmem>>, vector<8x8xf32>
      %c0_13 = arith.constant 0 : index
      %c0_14 = arith.constant 0 : index
      %14 = vector.load %arg9[%c0_13, %c0_14] : memref<8x32xf32, #tpu.memory_space<vmem>>, vector<8x32xf32>
      %cst_15 = arith.constant dense<0.000000e+00> : vector<8x32xf32>
      %15 = tpu.matmul %13, %14, %cst_15 {dimension_numbers = #tpu.dot_dimension_numbers<[1], [0], [0], [1], [0, 0, 1, 1], [], []>} : vector<8x8xf32>, vector<8x32xf32>, vector<8x32xf32> -> vector<8x32xf32>
      %c0_16 = arith.constant 0 : index
      %c0_17 = arith.constant 0 : index
      %16 = vector.load %arg5[%c0_16, %c0_17] : memref<8x1xf32, #tpu.memory_space<vmem>>, vector<8x1xf32>
      %17 = vector.broadcast %16 : vector<8x1xf32> to vector<8x32xf32>
      %18 = arith.addf %15, %17 : vector<8x32xf32>
      %c0_18 = arith.constant 0 : index
      %c0_19 = arith.constant 0 : index
      %19 = vector.load %arg6[%c0_18, %c0_19] : memref<8x32xf32, #tpu.memory_space<vmem>>, vector<8x32xf32>
      %20 = arith.mulf %18, %19 : vector<8x32xf32>
      %cst_20 = arith.constant 0.000000e+00 : f32
      %21 = vector.broadcast %cst_20 : f32 to vector<8x32xf32>
      %22 = arith.maximumf %20, %21 : vector<8x32xf32>
      %c0_21 = arith.constant 0 : index
      %c0_22 = arith.constant 0 : index
      %23 = vector.load %arg7[%c0_21, %c0_22] : memref<16x8xf32, #tpu.memory_space<vmem>>, vector<16x8xf32>
      %cst_23 = arith.constant dense<0.000000e+00> : vector<16x32xf32>
      %24 = tpu.matmul %23, %22, %cst_23 {dimension_numbers = #tpu.dot_dimension_numbers<[1], [0], [0], [1], [0, 0, 1, 1], [], []>} : vector<16x8xf32>, vector<8x32xf32>, vector<16x32xf32> -> vector<16x32xf32>
      %c0_24 = arith.constant 0 : index
      %c0_25 = arith.constant 0 : index
      %c0_26 = arith.constant 0 : index
      %25 = vector.load %arg8[%c0_24, %c0_25, %c0_26] : memref<1x16x32xf32, #tpu.memory_space<vmem>>, vector<1x16x32xf32>
      %26 = vector.shape_cast %25 : vector<1x16x32xf32> to vector<16x32xf32>
      %27 = vector.shape_cast %24 : vector<16x32xf32> to vector<1x16x32xf32>
      tpu.vector_store %arg8[%c0_24, %c0_25, %c0_26], %27 {strides = array<i32>} : memref<1x16x32xf32, #tpu.memory_space<vmem>>, vector<1x16x32xf32>,
    } else {
    }
    return
  }
  func.func @transform_0(%arg0: i32, %arg1: i32) -> (i32, i32, i32) {
    %c0_i32 = arith.constant 0 : i32
    %c0_i32_0 = arith.constant 0 : i32
    return %arg0, %c0_i32, %arg1 : i32, i32, i32
  }
  func.func @transform_1(%arg0: i32, %arg1: i32) -> (i32, i32) {
    %c0_i32 = arith.constant 0 : i32
    %c0_i32_0 = arith.constant 0 : i32
    return %c0_i32, %arg1 : i32, i32
  }
  func.func @transform_2(%arg0: i32, %arg1: i32) -> (i32, i32) {
    %c0_i32 = arith.constant 0 : i32
    %c0_i32_0 = arith.constant 0 : i32
    %c0_i32_1 = arith.constant 0 : i32
    return %c0_i32, %c0_i32_0 : i32, i32
  }
  func.func @transform_3(%arg0: i32, %arg1: i32) -> (i32, i32) {
    %c0_i32 = arith.constant 0 : i32
    %c0_i32_0 = arith.constant 0 : i32
    %c0_i32_1 = arith.constant 0 : i32
    return %c0_i32, %c0_i32_0 : i32, i32
  }
  func.func @transform_4(%arg0: i32, %arg1: i32) -> (i32, i32) {
    %c0_i32 = arith.constant 0 : i32
    %c0_i32_0 = arith.constant 0 : i32
    %c0_i32_1 = arith.constant 0 : i32
    return %c0_i32, %c0_i32_0 : i32, i32
  }
  func.func @transform_5(%arg0: i32, %arg1: i32) -> (i32, i32) {
    %c0_i32 = arith.constant 0 : i32
    %c0_i32_0 = arith.constant 0 : i32
    %c0_i32_1 = arith.constant 0 : i32
    return %c0_i32, %c0_i32_0 : i32, i32
  }
  func.func @transform_6(%arg0: i32, %arg1: i32) -> (i32, i32, i32) {
    %c0_i32 = arith.constant 0 : i32
    %c0_i32_0 = arith.constant 0 : i32
    %c0_i32_1 = arith.constant 0 : i32
    return %arg0, %c0_i32, %c0_i32_0 : i32, i32, i32
  }
}

module attributes {stable_mosaic.version = 11 : i64} {
  func.func @_ppm_out_kernel(%arg0: i32, %arg1: i32, %arg2: memref<1x16x40xbf16, #tpu.memory_space<vmem>>, %arg3: memref<1x8x256xf32, #tpu.memory_space<vmem>>, %arg4: memref<32x256xbf16, #tpu.memory_space<vmem>>, %arg5: memref<16x1xf32, #tpu.memory_space<vmem>>, %arg6: memref<1x16x256xbf16, #tpu.memory_space<vmem>>, %arg7: memref<40x256xbf16, #tpu.memory_space<vmem>>) attributes {dimension_semantics = [#tpu.dimension_semantics<parallel>, #tpu.dimension_semantics<parallel>], iteration_bounds = array<i64: 2, 1>, scalar_prefetch = 0 : i64, scratch_operands = 1 : i64, tpu.core_type = #tpu.core_type<tc>, window_params = [{transform_indices = @transform_0, window_bounds = array<i64: 1, 16, 40>}, {transform_indices = @transform_1, window_bounds = array<i64: 1, 8, 256>}, {transform_indices = @transform_2, window_bounds = array<i64: 32, 256>}, {pipeline_mode = #tpu.pipeline_mode<synchronous>, transform_indices = @transform_3, window_bounds = array<i64: 16, 1>}, {transform_indices = @transform_4, window_bounds = array<i64: 1, 16, 256>}]} {
    %c0 = arith.constant 0 : index
    %c0_0 = arith.constant 0 : index
    %0 = vector.load %arg4[%c0, %c0_0] : memref<32x256xbf16, #tpu.memory_space<vmem>>, vector<32x256xbf16>
    %c0_1 = arith.constant 0 : index
    %c0_2 = arith.constant 0 : index
    %1 = vector.load %arg7[%c0_1, %c0_2] : memref<40x256xbf16, #tpu.memory_space<vmem>>, vector<32x256xbf16>
    tpu.vector_store %arg7[%c0_1, %c0_2], %0 {strides = array<i32>} : memref<40x256xbf16, #tpu.memory_space<vmem>>, vector<32x256xbf16>,
    %c0_3 = arith.constant 0 : index
    %c0_4 = arith.constant 0 : index
    %c0_5 = arith.constant 0 : index
    %2 = vector.load %arg3[%c0_3, %c0_4, %c0_5] : memref<1x8x256xf32, #tpu.memory_space<vmem>>, vector<1x8x256xf32>
    %3 = vector.shape_cast %2 : vector<1x8x256xf32> to vector<8x256xf32>
    %4 = arith.truncf %3 : vector<8x256xf32> to vector<8x256xbf16>
    %c32 = arith.constant 32 : index
    %c0_6 = arith.constant 0 : index
    %5 = vector.load %arg7[%c32, %c0_6] : memref<40x256xbf16, #tpu.memory_space<vmem>>, vector<8x256xbf16>
    tpu.vector_store %arg7[%c32, %c0_6], %4 {strides = array<i32>} : memref<40x256xbf16, #tpu.memory_space<vmem>>, vector<8x256xbf16>,
    %c0_7 = arith.constant 0 : index
    %c0_8 = arith.constant 0 : index
    %c0_9 = arith.constant 0 : index
    %6 = vector.load %arg2[%c0_7, %c0_8, %c0_9] : memref<1x16x40xbf16, #tpu.memory_space<vmem>>, vector<1x16x40xbf16>
    %7 = vector.shape_cast %6 : vector<1x16x40xbf16> to vector<16x40xbf16>
    %c0_10 = arith.constant 0 : index
    %c0_11 = arith.constant 0 : index
    %8 = vector.load %arg7[%c0_10, %c0_11] : memref<40x256xbf16, #tpu.memory_space<vmem>>, vector<40x256xbf16>
    %cst = arith.constant dense<0.000000e+00> : vector<16x256xf32>
    %9 = tpu.matmul %7, %8, %cst {dimension_numbers = #tpu.dot_dimension_numbers<[1], [0], [0], [1], [0, 0, 1, 1], [], []>} : vector<16x40xbf16>, vector<40x256xbf16>, vector<16x256xf32> -> vector<16x256xf32>
    %c0_12 = arith.constant 0 : index
    %c0_13 = arith.constant 0 : index
    %10 = vector.load %arg5[%c0_12, %c0_13] : memref<16x1xf32, #tpu.memory_space<vmem>>, vector<16x1xf32>
    %11 = vector.broadcast %10 : vector<16x1xf32> to vector<16x256xf32>
    %12 = arith.addf %9, %11 : vector<16x256xf32>
    %cst_14 = arith.constant 0.000000e+00 : f32
    %13 = vector.broadcast %cst_14 : f32 to vector<16x256xf32>
    %14 = arith.maximumf %12, %13 : vector<16x256xf32>
    %15 = arith.truncf %14 : vector<16x256xf32> to vector<16x256xbf16>
    %c0_15 = arith.constant 0 : index
    %c0_16 = arith.constant 0 : index
    %c0_17 = arith.constant 0 : index
    %16 = vector.load %arg6[%c0_15, %c0_16, %c0_17] : memref<1x16x256xbf16, #tpu.memory_space<vmem>>, vector<1x16x256xbf16>
    %17 = vector.shape_cast %16 : vector<1x16x256xbf16> to vector<16x256xbf16>
    %18 = vector.shape_cast %15 : vector<16x256xbf16> to vector<1x16x256xbf16>
    tpu.vector_store %arg6[%c0_15, %c0_16, %c0_17], %18 {strides = array<i32>} : memref<1x16x256xbf16, #tpu.memory_space<vmem>>, vector<1x16x256xbf16>,
    return
  }
  func.func @transform_0(%arg0: i32, %arg1: i32) -> (i32, i32, i32) {
    %c0_i32 = arith.constant 0 : i32
    %c0_i32_0 = arith.constant 0 : i32
    %c0_i32_1 = arith.constant 0 : i32
    return %arg0, %c0_i32, %c0_i32_0 : i32, i32, i32
  }
  func.func @transform_1(%arg0: i32, %arg1: i32) -> (i32, i32, i32) {
    %c0_i32 = arith.constant 0 : i32
    %c0_i32_0 = arith.constant 0 : i32
    return %arg0, %c0_i32, %arg1 : i32, i32, i32
  }
  func.func @transform_2(%arg0: i32, %arg1: i32) -> (i32, i32) {
    %c0_i32 = arith.constant 0 : i32
    %c0_i32_0 = arith.constant 0 : i32
    return %c0_i32, %arg1 : i32, i32
  }
  func.func @transform_3(%arg0: i32, %arg1: i32) -> (i32, i32) {
    %c0_i32 = arith.constant 0 : i32
    %c0_i32_0 = arith.constant 0 : i32
    %c0_i32_1 = arith.constant 0 : i32
    return %c0_i32, %c0_i32_0 : i32, i32
  }
  func.func @transform_4(%arg0: i32, %arg1: i32) -> (i32, i32, i32) {
    %c0_i32 = arith.constant 0 : i32
    %c0_i32_0 = arith.constant 0 : i32
    return %arg0, %c0_i32, %arg1 : i32, i32, i32
  }
}

</mosaic_0001>

<bundles_post_ra>
// kernel: _ppm_pallas.3
= control target key start
LH: loop header
LB: loop body
LE: loop exit
PB: predicated region body
PF: predicated region fallthrough
CT: control target
= control target key end

     0   :  { %9 = vsyncpa [#allocation4], 0  ;;  %s837_s0 = inlined_call_operand.vmem [shape: bf16[2,16,40], index: 0, kind: input, shape index: {}]   ;;  %s838_s1 = inlined_call_operand.vmem [shape: f32[2,8,256], index: 1, kind: input, shape index: {}]   ;;  %s839_s2 = inlined_call_operand.vmem [shape: bf16[32,256], index: 2, kind: input, shape index: {}]   ;;  %s840_s3 = inlined_call_operand.vmem [shape: f32[16,1], index: 3, kind: input, shape index: {}]   ;;  %s841_s4 = inlined_call_operand.hbm [shape: bf16[2,16,256], index: 4, kind: output, shape index: {}]  }
   0x1   :  { %11 = vsyncpa [#allocation4 + $0x1], 0  ;;  %s715_s15 = smov 0   ;;  %s717_s16 = smov 0  }
   0x2   :  { %s719_s17 = smov 0   ;;  %s721_s18 = smov 0  }
   0x3   :  { %s723_s19 = smov 0   ;;  %s725_s20 = smov 0  }
   0x4 LB: > { %s502_s21 = sadd.s32 4294967295, %s685_s20   ;;  %s503_s22 = sadd.s32 4294967294, %s685_s20   ;;  %s685_s20 = sphi %s725_s20, %s17_s20   ;;  %s681_s19 = sphi %s723_s19, %s848_s19   ;;  %s677_s18 = sphi %s721_s18, %s847_s18   ;;  %s673_s17 = sphi %s719_s17, %s846_s17   ;;  %s669_s16 = sphi %s717_s16, %s845_s16   ;;  %s665_s15 = sphi %s715_s15, %s844_s15  }
   0x5   : > { %s29_s23 = sadd.s32 1, %s681_s19  ;;  %s139_s24 = sadd.s32 1, %s673_s17 }
   0x6   : > { %p31_p0 = scmp.ge.s32.totalorder %s29_s23, 2  ;;  %p149_p1 = scmp.ne.s32.totalorder %s673_s17, %s669_s16 }
   0x7   : > { %p150_p2 = scmp.eq.s32.totalorder %s502_s21, 1  ;;  %p155_p3 = scmp.ne.s32.totalorder %s669_s16, %s665_s15 }
   0x8   : > { %s850_s23 = smov (%p31_p0, %s29_s23), 0  ;;  %p156_p5 = scmp.eq.s32.totalorder %s503_s22, 1 }
   0x9   : > { %p755_p4 = por %p150_p2, %p149_p1  ;;  %s134_s26 = ssub.s32 %s681_s19, %s850_s23 }
   0xa   : > { %p507_p6 = scmp.ge.s32.totalorder %s685_s20, 1  ;;  %p137_p7 = scmp.eq.s32.totalorder %s134_s26, 0 }
   0xb   : > { %p762_p8 = por %p156_p5, %p155_p3  ;;  %p207_p9 = scmp.lt.s32.totalorder %s685_s20, 3 }
   0xc   : > { %s768_s28 = scalar_select %p137_p7, %s673_s17, %s139_s24  }
   0xd   : > { %p208_p10 = pnand %p507_p6, %p207_p9 }
   0xe   : > { %p247_p11 = scmp.lt.s32.totalorder (!%p208_p10), %s677_s18, 1  ;;  %s244_s8 = sand.u32 (!%p208_p10), 1, %s669_s16  }
   0xf   : > { %211 = sbr.rel (%p208_p10) target bundleno = 187 (0xbb), region = 36  ;;  %s508_s9 = sshll.u32 (!%p208_p10), %s244_s8, 4 }
  0x10   : > { %s547_s10 = sshll.u32 (!%p208_p10), %s677_s18, 4  ;;  %s627_s5 = scalar_lea.hbm (!%p208_p10), %s841_s4, 32 }
  0x14   : > { %v272_v0 = vld [vmem:[%s839_s2 + $0x10] sm:$0xff]  ;;  %v273_v1 = vld [vmem:[%s839_s2 + $0x18] sm:$0xff]  ;;  %v270_v2 = vld [vmem:[%s839_s2] sm:$0xff]  ;;  %s787_s13 = scalar_select %p247_p11, %s677_s18, 1  ;;  %v687_v5 = vmov 0   ;;  %vm335_vm0 = vcmask 1043456  }
  0x15   : > { %276 = vst [vmem:[#allocation2 + $0x10] sm:$0xff] %v272_v0  ;;  %v271_v3 = vld [vmem:[%s839_s2 + $0x8] sm:$0xff]  ;;  %v289_v4 = vld [vmem:[%s840_s3] sm:$0xff]  ;;  %606 = vset.pattern.permute.xlu0 %v687_v5  ;;  %vm331_vm1 = vcmask 326656   ;;  %s379_s18 = scalar_lea.sflag [#allocation4], %s244_s8 }
  0x16   : > { %277 = vst [vmem:[#allocation2 + $0x18] sm:$0xff] %v273_v1  ;;  %293 = vperm.xlu0 %606, %v289_v4   ;;  %s541_s14 = sshll.u32 %s787_s13, 4  ;;  %v290_v9 = vld [vmem:[%s840_s3 + $0x8] sm:$0xff]  ;;  %s540_s30 = sshll.u32 %s787_s13, 3 }
  0x17   : > { %274 = vst [vmem:[#allocation2] sm:$0xff] %v270_v2  ;;  %s260_s24 = scalar_lea.vmem %s838_s1, %s541_s14  ;;  %s251_s7 = scalar_lea.vmem %s837_s0, %s540_s30 }
  0x18   : > { %275 = vst [vmem:[#allocation2 + $0x8] sm:$0xff] %v271_v3  ;;  %v278_v6 = vld [vmem:[%s260_s24] sm:$0xff]  ;;  %v279_v7 = vld [vmem:[%s260_s24 + $0x8] sm:$0xff]  ;;  %s392_s13 = scalar_lea.hbm %s841_s4, %s547_s10  ;;  %s246_s14 = scalar_lea.vmem [#allocation3], %s508_s9 }
  0x19   : > { %v280_v8 = vpack.c.bf16 %v279_v7, %v278_v6  ;;  %v542_v28 = vld [vmem:[%s251_s7] sm:$0xff]  ;;  %s393_s21 = sshll.u32 %s246_s14, 4  ;;  %s395_s22 = sshll.u32 %s392_s13, 4  ;;  %s394_s21 = int_to_ptr.vmem [resolvable:$true] %s393_s21  ;;  %s396_s22 = int_to_ptr.hbm [resolvable:$true] %s395_s22 }
  0x1a   : > { %s621_s24 = sshra.s32 %s396_s22, 4  ;;  %s622_s24 = int_to_ptr.hbm [resolvable:$true] %s621_s24 }
  0x1b   : > { %v319_v10 = vunpack.c.l.b16 %v280_v8  ;;  %v320_v11 = vunpack.c.h.b16 %v280_v8  ;;  %s623_s26 = scalar_lea.hbm %s622_s24, 16  ;;  %p628_p1 = scmp.lt.s32.totalorder %s622_s24, %s841_s4 }
  0x1c   : > { %v527_v12 = vld [vmem:[#allocation2 + $0x10] sm:$0xf]  ;;  %v545_v16 = vld [vmem:[#allocation2 + $0x14] sm:$0xf]  ;;  %p624_p12 = scmp.ne.s32.totalorder %s622_s24, %s623_s26  ;;  %p629_p2 = scmp.lt.s32.totalorder %s627_s5, %s623_s26 }
  0x1d   : > { %v325_v13 = vpack.c.b16 %v319_v10, %v319_v10  ;;  %v326_v14 = vpack.c.b16 %v320_v11, %v320_v11  ;;  %v546_v15 = vld [vmem:[#allocation2 + $0x14] sm:$0xf0]  ;;  %v529_v17 = vld [vmem:[#allocation2 + $0x18] sm:$0xf0] }
  0x1e   : > { %298 = vperm.xlu0 %606, %v290_v9   ;;  %v528_v20 = vor.u32 %v546_v15, %v527_v12  ;;  %v532_v21 = vor.u32 %v545_v16, %v529_v17  ;;  %v519_v22 = vld [vmem:[#allocation2] sm:$0xf]  ;;  %v543_v24 = vld [vmem:[#allocation2 + $0x4] sm:$0xf]  ;;  %p625_p13 = pnand %p624_p12, %p755_p4  ;;  %p630_p3 = por %p629_p2, %p628_p1 }
  0x1f   : > { %v337_v18 = vsel %vm335_vm0, %v325_v13, 0  ;;  %v340_v19 = vsel %vm335_vm0, %v326_v14, 0  ;;  %v544_v23 = vld [vmem:[#allocation2 + $0x4] sm:$0xf0]  ;;  %v521_v25 = vld [vmem:[#allocation2 + $0x8] sm:$0xf0] }
  0x20   : > { %347 = vmatpush.bf16.msra.mxu0 %v337_v18  ;;  %361 = vmatpush.bf16.msra.mxu1 %v340_v19  ;;  %v520_v26 = vor.u32 %v544_v23, %v519_v22  ;;  %v524_v27 = vor.u32 %v543_v24, %v521_v25  ;;  %p626_p0 = pneg %p625_p13 }
  0x22   : > { %p631_p5 = pnand %p630_p3, %p626_p0 }
  0x24   : > { %348 = vmatpush.bf16.msra.mxu0 %v528_v20  ;;  %362 = vmatpush.bf16.msra.mxu1 %v532_v21 }
  0x28   : > { %349 = vmatpush.bf16.msra.mxu0 %v520_v26  ;;  %363 = vmatpush.bf16.msra.mxu1 %v524_v27 }
  0x2b   : > { %533 = vmatmul.msk.bf16.vlgmr.msra.gmra.mxu0 %vm331_vm1, %v542_v28  ;;  %534 = vmatmul.msk.bf16.vlgmr.msra.gmra.mxu1 %vm331_vm1, %v542_v28 }
  0x88   : > { %v294_v29 = vpop.permute.xlu0 %293 }
  0x90   : > { %v299_v37 = vpop.permute.xlu0 %298 }
  0xa8   : > { %v351_v30 = vpop.f32.mrf.mxu0  ;;  %v365_v31 = vpop.f32.mrf.mxu1 }
  0xa9   : > { %v352_v32 = vadd.f32 %v351_v30, %v294_v29  ;;  %v366_v33 = vadd.f32 %v365_v31, %v294_v29 }
  0xab   : > { %v370_v34 = vmax.f32 %v352_v32, 0.0  ;;  %v371_v35 = vmax.f32 %v366_v33, 0.0 }
  0xad   : > { %v374_v36 = vpack.c.bf16 %v371_v35, %v370_v34 }
  0xaf   : > { %376 = vst [vmem:[%s246_s14] sm:$0xff] %v374_v36 }
  0xb0   : > { %v353_v38 = vpop.f32.mrf.mxu0  ;;  %v367_v39 = vpop.f32.mrf.mxu1 }
  0xb1   : > { %v354_v40 = vadd.f32 %v353_v38, %v299_v37  ;;  %v368_v41 = vadd.f32 %v367_v39, %v299_v37 }
  0xb3   : > { %v372_v42 = vmax.f32 %v354_v40, 0.0  ;;  %v373_v43 = vmax.f32 %v368_v41, 0.0 }
  0xb5   : > { %v375_v44 = vpack.c.bf16 %v373_v43, %v372_v42 }
  0xb7   : > { %377 = vst [vmem:[%s246_s14 + $0x8] sm:$0xff] %v375_v44 }
  0xb8   : > { %634 = shalt.err (!%p631_p5)
}
  0xb9   : > { %s688_s8 = smov 128   ;;  %s689_s9 = smov 8  }
  0xba   : > { %548 = dma.vmem_to_hbm [thread:$0]  (%p755_p4), %s394_s21, 256, %s396_s22, %s379_s18, %s688_s8, %s688_s8, %s689_s9  }
  0xbb PF: > { %p554_p6 = scmp.ge.s32.totalorder %s685_s20, 2  ;;  %s410_s10 = sand.u32 1, %s665_s15  }
  0xbc   : > { %s411_s11 = scalar_lea.sflag [#allocation4], %s410_s10 }
  0xbd   : > { %p551_p7 = pnand %p554_p6, %p762_p8 }
  0xbf   : > { %p552_p9 = pneg %p551_p7 }
  0xc1   : > { %660 = dma.done.wait (%p552_p9), %s411_s11, 256  }
  0xc2   : > { %662 = vsyncadd (%p552_p9), %s411_s11, 4294967040  ;;  %s17_s20 = sadd.s32 1, %s685_s20   ;;  %s844_s15 = smov %s669_s16 }
  0xc3   : > { %p14_p10 = scmp.ge.s32.totalorder %s17_s20, 4   ;;  %s845_s16 = smov %s673_s17 }
  0xc4   : > { %s846_s17 = smov %s768_s28  ;;  %s847_s18 = smov %s681_s19 }
  0xc5   : > { %s848_s19 = smov %s850_s23  ;;  %16 = sbr.rel (!%p14_p10) target bundleno = 4 (0x4), region = 77 }
  0xca   :  { %417 = vsyncpa [#allocation4], 1 }
  0xcb   :  { %419 = vsyncpa [#allocation4 + $0x1], 1 }

// kernel: _ppm_pallas.2
= control target key start
LH: loop header
LB: loop body
LE: loop exit
PB: predicated region body
PF: predicated region fallthrough
CT: control target
= control target key end

     0   :  { %11 = vsyncpa [#allocation4], 0  ;;  %s914_s0 = inlined_call_operand.vmem [shape: f32[2,8,256], index: 0, kind: input, shape index: {}]   ;;  %s915_s1 = inlined_call_operand.hbm [shape: f32[32,256], index: 1, kind: input, shape index: {}]   ;;  %s916_s2 = inlined_call_operand.hbm [shape: f32[8,8], index: 2, kind: input, shape index: {}]   ;;  %s917_s3 = inlined_call_operand.vmem [shape: f32[8,1], index: 3, kind: input, shape index: {}]   ;;  %s918_s4 = inlined_call_operand.hbm [shape: f32[8,32], index: 4, kind: input, shape index: {}]   ;;  %s919_s5 = inlined_call_operand.vmem [shape: f32[16,8], index: 5, kind: input, shape index: {}]   ;;  %s920_s6 = inlined_call_operand.vmem [shape: f32[2,16,32], index: 6, kind: output, shape index: {}]  }
   0x1   :  { %12 = vsyncpa [#allocation6], 0  ;;  %s815_s21 = smov 0   ;;  %s817_s22 = smov 0  }
   0x2   :  { %s819_s23 = smov 0  }
   0x3 LB: > { %s228_s26 = sshll.u32 %s916_s2, 4  ;;  %s569_s27 = sadd.s32 4294967295, %s771_s23   ;;  %s771_s23 = sphi %s819_s23, %s18_s23   ;;  %s767_s22 = sphi %s817_s22, %s925_s22   ;;  %s763_s21 = sphi %s815_s21, %s924_s21   ;;  %s229_s26 = int_to_ptr.hbm [resolvable:$true] %s228_s26 }
   0x4   : > { %p571_p0 = scmp.ge.s32.totalorder %s771_s23, 1  ;;  %p199_p1 = scmp.lt.s32.totalorder %s771_s23, 3 }
   0x5   : > { %p836_p2 = scmp.eq.s32.totalorder %s569_s27, 0  ;;  %s773_s30 = smov [#allocation5]  }
   0x6   : > { %p840_p3 = pnand %p571_p0, %p199_p1  ;;  %s230_s7 = sshll.u32 %s773_s30, 4  ;;  %s231_s7 = int_to_ptr.vmem [resolvable:$true] %s230_s7 }
   0x7   : > { %s30_s9 = sadd.s32 1, %s767_s22  ;;  %s213_s12 = sshll.u32 %s915_s1, 4  ;;  %s214_s12 = int_to_ptr.hbm [resolvable:$true] %s213_s12 }
   0x8   : > { %p603_p4 = pneg %p840_p3  ;;  %p32_p6 = scmp.ge.s32.totalorder %s30_s9, 2 }
   0x9   : > { %s774_s13 = smov [#allocation3]   ;;  %s243_s17 = sshll.u32 %s918_s4, 4  ;;  %s244_s17 = int_to_ptr.hbm [resolvable:$true] %s243_s17 }
   0xa   : > { %p848_p5 = pnand %p836_p2, %p603_p4  ;;  %s927_s9 = smov (%p32_p6, %s30_s9), 0 }
   0xb   : > { %s215_s14 = sshll.u32 %s774_s13, 4  ;;  %s775_s18 = smov 256   ;;  %s216_s14 = int_to_ptr.vmem [resolvable:$true] %s215_s14 }
   0xc   : > { %609 = dma.hbm_to_vmem [thread:$0]  (!%p848_p5), %s229_s26, 128, %s231_s7, [#allocation6]  }
   0xd   : > { %s776_s19 = smov 16   ;;  %s777_s20 = smov [#allocation7]  }
   0xe   : > { %606 = dma.hbm_to_vmem [thread:$0]  (!%p848_p5), %s214_s12, 1024, %s216_s14, [#allocation4], %s775_s18, %s775_s18, %s776_s19  }
   0xf   : > { %s245_s24 = sshll.u32 %s777_s20, 4  ;;  %274 = sbr.rel (%p840_p3) target bundleno = 458 (0x1ca), region = 44  ;;  %s246_s24 = int_to_ptr.vmem [resolvable:$true] %s245_s24 }
  0x10   : > { %612 = dma.hbm_to_vmem [thread:$0]  (!%p848_p5), %s244_s17, 128, %s246_s24, [#allocation6]  }
  0x14   : > { %754 = dma.done.wait (%p836_p2), [#allocation4], 1024  }
  0x15   : > { %756 = vsyncadd (%p836_p2), [#allocation4], 4294966272 }
  0x16   : > { %758 = dma.done.wait (%p836_p2), [#allocation6], 256  }
  0x17   : > { %760 = vsyncadd (%p836_p2), [#allocation6], 4294967040  ;;  %p320_p7 = scmp.lt.s32.totalorder %s763_s21, 1  ;;  %v350_v0 = vld [vmem:[#allocation3 + $0x30] sm:$0xff]  ;;  %v351_v1 = vld [vmem:[#allocation3 + $0x38] sm:$0xff]  ;;  %vm339_vm0 = vcmask 261120  }
  0x18   : > { %364 = vmatpush.xpose.msra.mxu0 %v350_v0  ;;  %384 = vmatpush.xpose.msra.mxu1 %v351_v1  ;;  %v348_v2 = vld [vmem:[#allocation3 + $0x20] sm:$0xff]  ;;  %v349_v3 = vld [vmem:[#allocation3 + $0x28] sm:$0xff]  ;;  %v346_v4 = vld [vmem:[#allocation3 + $0x10] sm:$0xff]  ;;  %v778_v10 = vmov 0.0   ;;  %v779_v12 = vmov 0   ;;  %vm406_vm1 = vcmask 64512  }
  0x19   : > { %s929_s21 = smov (!%p320_p7, %s763_s21), 1  ;;  %v347_v5 = vld [vmem:[#allocation3 + $0x18] sm:$0xff]  ;;  %v344_v6 = vld [vmem:[#allocation3] sm:$0xff]  ;;  %v345_v7 = vld [vmem:[#allocation3 + $0x8] sm:$0xff]  ;;  %340 = vst.msk [vmem:[#allocation2] sm:$0xff] %vm339_vm0, %v778_v10  ;;  %650 = vset.pattern.permute.xlu0 %v779_v12 }
  0x1a   : > { %s589_s25 = sshll.u32 %s929_s21, 4  ;;  %v400_v11 = vld [vmem:[%s917_s3] sm:$0xff]  ;;  %v398_v18 = vld [vmem:[#allocation5] sm:$0xff]  ;;  %v430_v22 = vld [vmem:[#allocation7] sm:$0xff] }
  0x1b   : > { %s327_s28 = scalar_lea.vmem %s914_s0, %s589_s25  ;;  %403 = vperm.xlu0 %650, %v400_v11   ;;  %v433_v26 = vld [vmem:[%s919_s5] sm:$0xff]  ;;  %v434_v27 = vld [vmem:[%s919_s5 + $0x8] sm:$0xff]  ;;  %s334_s14 = scalar_lea.vmem %s920_s6, %s589_s25 }
  0x1c   : > { %365 = vmatpush.xpose.msra.mxu0 %v348_v2  ;;  %385 = vmatpush.xpose.msra.mxu1 %v349_v3  ;;  %v342_v8 = vld [vmem:[%s327_s28] sm:$0xff]  ;;  %v343_v9 = vld [vmem:[%s327_s28 + $0x8] sm:$0xff] }
  0x20   : > { %366 = vmatpush.xpose.msra.mxu0 %v346_v4  ;;  %386 = vmatpush.xpose.msra.mxu1 %v347_v5  ;;  %v341_v14 = vld [vmem:[#allocation2] sm:$0xff] }
  0x24   : > { %367 = vmatpush.xpose.msra.mxu0 %v344_v6  ;;  %387 = vmatpush.xpose.msra.mxu1 %v345_v7 }
  0x27   : > { %368 = vmatmul.f32.vlgmr.msra.gmra.mxu0 %v342_v8  ;;  %388 = vmatmul.f32.vlgmr.msra.gmra.mxu1 %v343_v9 }
  0x8d   : > { %v404_v20 = vpop.permute.xlu0 %403 }
  0xa4   : > { %v369_v13 = vpop.f32.mrf.mxu0  ;;  %v389_v15 = vpop.f32.mrf.mxu1 }
  0xa5   : > { %v390_v16 = vadd.f32 %v389_v15, %v369_v13 }
  0xa7   : > { %v392_v17 = vadd.f32 %v390_v16, %v341_v14 }
  0xa9   : > { %394 = vst.msk [vmem:[#allocation2] sm:$0xff] %vm339_vm0, %v392_v17 }
  0xb0   : > { %v399_v19 = vld [vmem:[#allocation2] sm:$0xff] }
  0xb1   : > { %425 = vmatpush.msra.mxu2 %v399_v19 }
  0xb2   : > { %584 = vmatmul.msk.f32.vlgmr.msra.gmra.mxu2 %vm406_vm1, %v398_v18 }
 0x135   : > { %v427_v21 = vpop.f32.mrf.mxu2 }
 0x136   : > { %v428_v23 = vadd.f32 %v427_v21, %v404_v20 }
 0x138   : > { %v431_v24 = vmul.f32 %v430_v22, %v428_v23 }
 0x13a   : > { %v432_v25 = vmax.f32 %v431_v24, 0.0 }
 0x13c   : > { %456 = vmatpush.msra.mxu3 %v432_v25 }
 0x13d   : > { %585 = vmatmul.msk.f32.vlgmr.msra.gmra.mxu3 %vm406_vm1, %v433_v26 }
 0x145   : > { %586 = vmatmul.msk.f32.gmra.mxu3 %vm406_vm1, %v434_v27 }
 0x1c0   : > { %v458_v28 = vpop.f32.mrf.mxu3 }
 0x1c1   : > { %464 = vst.msk [vmem:[%s334_s14] sm:$0xff] %vm339_vm0, %v458_v28 }
 0x1c8   : > { %v461_v29 = vpop.f32.mrf.mxu3 }
 0x1c9   : > { %465 = vst.msk [vmem:[%s334_s14 + $0x8] sm:$0xff] %vm339_vm0, %v461_v29 }
 0x1ca PF: > { %s18_s23 = sadd.s32 1, %s771_s23   ;;  %s924_s21 = smov %s767_s22 }
 0x1cb   : > { %p15_p8 = scmp.ge.s32.totalorder %s18_s23, 4   ;;  %s925_s22 = smov %s927_s9 }
 0x1cd   :  { %17 = sbr.rel (!%p15_p8) target bundleno = 3 (0x3), region = 96 }
 0x1d2   :  { %487 = vsyncpa [#allocation4], 1 }
 0x1d3   :  { %489 = vsyncpa [#allocation4 + $0x1], 1 }
 0x1d4   :  { %490 = vsyncpa [#allocation6], 1 }

</bundles_post_ra>
